<compile_context>
chip_gen: v7x
topology: tpu7x:2x2x1
jax: 0.10.0
libtpu: 0.0.40
codegen_flags: <defaults>
</compile_context>

<pallas_src>
import functools

import jax
import jax.numpy as jnp
from jax.experimental import pallas as pl
from jax.experimental.pallas import tpu as pltpu


def _round_up(a, m):
    return (a + m - 1) // m * m


def _pick_d_tile(d_pad, lo=512, hi=2048):
    """Pick the lane tile (td) for the D axis and the final padded D.

    Prefers the largest divisor of d_pad in [lo, hi] (multiple of 128 -> no
    dead columns streamed through w_in/w_out); otherwise the tile in [lo, hi]
    minimizing round-up waste (larger tile wins ties).
    """
    if d_pad <= hi:
        return d_pad, d_pad
    for cand in range(hi, lo - 1, -128):
        if d_pad % cand == 0:
            return cand, d_pad
    best_td, best_pad = lo, _round_up(d_pad, lo)
    for cand in range(lo + 128, hi + 1, 128):
        padded = _round_up(d_pad, cand)
        if padded <= best_pad:
            best_td, best_pad = cand, padded
    return best_td, best_pad


# ----------------------------------------------------------------------------
# Encode kernel: x (tm, td) tiles, K-reduction over D into an f32 accumulator.
# At the last K step: bias + ReLU, the resident (nz_pad x nz_pad) hidden chain,
# then write the bf16 bottleneck h (tm, nz_pad).
# ----------------------------------------------------------------------------
def _encode_kernel(x_ref, w_in_ref, b_in_ref, w_mid_ref, b_mid_ref,
                   h_ref, acc_ref, *, n_mid):
    k = pl.program_id(1)

    @pl.when(k == 0)
    def _():
        acc_ref[...] = jnp.zeros_like(acc_ref)

    # x may arrive as f32 (aligned fast path) or bf16 (padded path); the cast
    # to bf16 is free VPU filler under the MXU.
    acc_ref[...] += jnp.dot(x_ref[...].astype(jnp.bfloat16), w_in_ref[...],
                            preferred_element_type=jnp.float32)

    @pl.when(k == pl.num_programs(1) - 1)
    def _():
        # f32 epilogue (bias + ReLU); bf16 into each MXU matmul.
        h = jnp.maximum(acc_ref[...] + b_in_ref[...], 0.0)
        for i in range(n_mid):  # static unroll, n_mid is a Python int
            h = jnp.dot(h.astype(w_mid_ref.dtype), w_mid_ref[i],
                        preferred_element_type=jnp.float32)
            h = jnp.maximum(h + b_mid_ref[i], 0.0)
        h_ref[...] = h.astype(h_ref.dtype)


# ----------------------------------------------------------------------------
# Decode kernel: lane-dense output projection  y[b, j] = h[b] @ w_out[:, j] + b.
# ----------------------------------------------------------------------------
def _decode_kernel(h_ref, w_out_ref, b_out_ref, o_ref):
    y = jnp.dot(h_ref[...], w_out_ref[...], preferred_element_type=jnp.float32)
    o_ref[...] = (y + b_out_ref[...]).astype(o_ref.dtype)


def prepare_params(params, *, d_tile_hi=2048):
    """One-time padding/casting of the MLP weights to MXU-friendly bf16 buffers.

    Weights are (in_features, out_features) = W^T of the torch.nn.Linear
    weight, so the kernels compute x @ W + b directly.  All padding is zeros
    (padded bias lanes MUST stay 0 for the hidden-chain padding argument to
    hold -- guaranteed here since buffers are built from jnp.zeros).

    Returns (prepared_arrays, static_cfg); static_cfg holds Python ints to be
    baked into the jitted forward (e.g. via functools.partial).
    """
    w_in, b_in, w_mid, b_mid, w_out, b_out = params
    D, nz = w_in.shape
    n_mid = w_mid.shape[0]
    nz_pad = _round_up(nz, 128)
    td, D_pad = _pick_d_tile(_round_up(D, 128), hi=d_tile_hi)

    bf16 = jnp.bfloat16
    f32 = jnp.float32
    w_in_p = jnp.zeros((D_pad, nz_pad), bf16).at[:D, :nz].set(w_in.astype(bf16))
    b_in_p = jnp.zeros((1, nz_pad), f32).at[:, :nz].set(
        b_in.astype(f32).reshape(1, nz))
    w_mid_p = jnp.zeros((n_mid, nz_pad, nz_pad), bf16).at[:, :nz, :nz].set(
        w_mid.astype(bf16))
    b_mid_p = jnp.zeros((n_mid, 1, nz_pad), f32).at[:, :, :nz].set(
        b_mid.astype(f32).reshape(n_mid, 1, nz))
    w_out_p = jnp.zeros((nz_pad, D_pad), bf16).at[:nz, :D].set(w_out.astype(bf16))
    b_out_p = jnp.zeros((1, D_pad), f32).at[:, :D].set(
        b_out.astype(f32).reshape(1, D))

    prepared = (w_in_p, b_in_p, w_mid_p, b_mid_p, w_out_p, b_out_p)
    cfg = dict(D=int(D), td=int(td))
    return prepared, cfg


def vanilla_ae_forward(x, prepared, *, D, td,
                       out_dtype=jnp.float32,
                       vmem_limit_bytes=48 * 1024 * 1024):
    """x: (B, nc, H, W) float32.  prepared/D/td from prepare_params().

    Returns the reconstruction with the same shape/dtype as x.
    out_dtype=jnp.bfloat16 halves the decode writeback (useful on v5e) when the
    consumer tolerates bf16.
    """
    w_in_p, b_in_p, w_mid_p, b_mid_p, w_out_p, b_out_p = prepared
    B = x.shape[0]
    assert x.shape[1] * x.shape[2] * x.shape[3] == D
    D_pad, nz_pad = w_in_p.shape
    n_mid = w_mid_p.shape[0]
    num_d = D_pad // td

    # Batch tiling: tm=256 when the batch allows (full MXU M-dim on v6e/v7x and
    # half the weight re-streaming vs tm=128); small batches use a single tile.
    B_pad = _round_up(B, 16)                  # bf16 sublane-packing granularity
    if B_pad >= 256:
        tm = 256
    elif B_pad >= 128:
        tm = 128
    else:
        tm = B_pad
    B_pad = _round_up(B_pad, tm)
    num_b = B_pad // tm
    # NOTE(v7x megacore): with num_b == 1 only one TC runs encode; splitting tm
    # would double w_in streaming (encode is HBM-bound at small batch), so we
    # deliberately keep a single batch tile here.

    bf16 = jnp.bfloat16
    x2d = x.reshape(B, D)
    if B == B_pad and D == D_pad:
        x_in = x2d                            # no pre-pass copy; cast in-kernel
    else:
        x_in = jnp.zeros((B_pad, D_pad), bf16).at[:B, :D].set(x2d.astype(bf16))

    # Resident (constant-index) encode inputs: single-buffer them when large so
    # the w_mid stack is not double-buffered into v7x's 64 MiB VMEM.
    def _resident_spec(shape, index_map):
        if nz_pad >= 512:
            return pl.BlockSpec(shape, index_map, pipeline_mode=pl.Buffered(1))
        return pl.BlockSpec(shape, index_map)

    # ---- phase 1: input projection (K-tiled) + hidden chain ---------------
    h = pl.pallas_call(
        functools.partial(_encode_kernel, n_mid=n_mid),
        out_shape=jax.ShapeDtypeStruct((B_pad, nz_pad), bf16),
        grid_spec=pltpu.PrefetchScalarGridSpec(
            num_scalar_prefetch=0,
            grid=(num_b, num_d),
            in_specs=[
                pl.BlockSpec((tm, td), lambda b, k: (b, k)),         # x (streamed)
                pl.BlockSpec((td, nz_pad), lambda b, k: (k, 0)),     # w_in (streamed)
                _resident_spec((1, nz_pad), lambda b, k: (0, 0)),    # b_in (resident)
                _resident_spec((n_mid, nz_pad, nz_pad),
                               lambda b, k: (0, 0, 0)),              # w_mid (resident)
                _resident_spec((n_mid, 1, nz_pad),
                               lambda b, k: (0, 0, 0)),              # b_mid (resident)
            ],
            out_specs=pl.BlockSpec((tm, nz_pad), lambda b, k: (b, 0)),
            scratch_shapes=[pltpu.VMEM((tm, nz_pad), jnp.float32)],
        ),
        compiler_params=pltpu.CompilerParams(
            dimension_semantics=("parallel", "arbitrary"),
            vmem_limit_bytes=vmem_limit_bytes),
    )(x_in, w_in_p, b_in_p, w_mid_p, b_mid_p)

    # ---- phase 2: output projection --------------------------------------
    # Grid is (D tiles, B tiles) with batch INNER: each lane-dense w_out/b_out
    # tile is fetched from HBM exactly once, independent of batch size.
    y_p = pl.pallas_call(
        _decode_kernel,
        out_shape=jax.ShapeDtypeStruct((B_pad, D_pad), out_dtype),
        grid_spec=pltpu.PrefetchScalarGridSpec(
            num_scalar_prefetch=0,
            grid=(num_d, num_b),
            in_specs=[
                pl.BlockSpec((tm, nz_pad), lambda j, b: (b, 0)),     # h (tiny, re-fetched)
                pl.BlockSpec((nz_pad, td), lambda j, b: (0, j)),     # w_out (once per j)
                pl.BlockSpec((1, td), lambda j, b: (0, j)),          # b_out (once per j)
            ],
            out_specs=pl.BlockSpec((tm, td), lambda j, b: (b, j)),
        ),
        compiler_params=pltpu.CompilerParams(
            dimension_semantics=("parallel", "parallel"),
            vmem_limit_bytes=vmem_limit_bytes),
    )(h, w_out_p, b_out_p)

    return y_p[:B, :D].reshape(x.shape).astype(x.dtype)


def init_params(key, nc, image_size, nz, nblk, dtype=jnp.float32):
    """Deterministic synthetic init matching the MLP's parameter shapes.

    Weights are stored as (in_features, out_features), i.e. W^T of the
    torch.nn.Linear weight, so the kernel computes x @ W + b directly.
    """
    assert nblk >= 3, "MLP needs at least input, one hidden, and output block"
    D = nc * image_size * image_size
    n_mid = nblk - 2
    keys = jax.random.split(key, 6)
    scale_in = 1.0 / jnp.sqrt(jnp.float32(D))
    scale_h = 1.0 / jnp.sqrt(jnp.float32(nz))
    w_in = jax.random.normal(keys[0], (D, nz), dtype) * scale_in
    b_in = jax.random.normal(keys[1], (1, nz), dtype) * scale_in
    w_mid = jax.random.normal(keys[2], (n_mid, nz, nz), dtype) * scale_h
    b_mid = jax.random.normal(keys[3], (n_mid, 1, nz), dtype) * scale_h
    w_out = jax.random.normal(keys[4], (nz, D), dtype) * scale_h
    b_out = jax.random.normal(keys[5], (1, D), dtype) * scale_h
    return w_in, b_in, w_mid, b_mid, w_out, b_out


def _reference_forward(x, params):
    """Plain-JAX reference mirroring the kernel numerics (bf16 in, f32 accum)."""
    w_in, b_in, w_mid, b_mid, w_out, b_out = params
    bf16 = jnp.bfloat16
    B = x.shape[0]
    h = jnp.dot(x.reshape(B, -1).astype(bf16), w_in.astype(bf16),
                preferred_element_type=jnp.float32)
    h = jnp.maximum(h + b_in, 0.0)
    for i in range(w_mid.shape[0]):
        h = jnp.dot(h.astype(bf16), w_mid[i].astype(bf16),
                    preferred_element_type=jnp.float32)
        h = jnp.maximum(h + b_mid[i], 0.0)
    y = jnp.dot(h.astype(bf16), w_out.astype(bf16),
                preferred_element_type=jnp.float32) + b_out
    return y.reshape(x.shape)


if __name__ == "__main__":
    # Small config consistent with the module: opt.nc, opt.imageSize, opt.nz, opt.nblk
    nc, image_size, nz, nblk = 4, 16, 32, 3
    batch = 2

    key = jax.random.PRNGKey(0)
    k_x, k_p = jax.random.split(key)
    x = jax.random.normal(k_x, (batch, nc, image_size, image_size), jnp.float32)
    params = init_params(k_p, nc, image_size, nz, nblk)

    # One-time weight prep (padding + bf16 cast), then a jitted forward.
    prepared, cfg = prepare_params(params)
    fwd = jax.jit(functools.partial(vanilla_ae_forward, **cfg))

    recon = jax.block_until_ready(fwd(x, prepared))

    ref = _reference_forward(x, params)
    assert recon.shape == x.shape
    max_err = float(jnp.max(jnp.abs(recon - ref)))
    assert jnp.allclose(recon, ref, atol=1e-2, rtol=1e-2), (
        f"mismatch vs JAX reference (max abs err {max_err})")

    print("KERNEL_OK")
</pallas_src>

<mosaic_0001>
module attributes {stable_mosaic.version = 11 : i64} {
  func.func @_encode_kernel(%arg0: i32, %arg1: i32, %arg2: memref<16x1024xbf16, #tpu.memory_space<vmem>>, %arg3: memref<1024x128xbf16, #tpu.memory_space<vmem>>, %arg4: memref<1x128xf32, #tpu.memory_space<vmem>>, %arg5: memref<1x128x128xbf16, #tpu.memory_space<vmem>>, %arg6: memref<1x1x128xf32, #tpu.memory_space<vmem>>, %arg7: memref<16x128xbf16, #tpu.memory_space<vmem>>, %arg8: memref<16x128xf32, #tpu.memory_space<vmem>>) attributes {dimension_semantics = [#tpu.dimension_semantics<parallel>, #tpu.dimension_semantics<arbitrary>], iteration_bounds = array<i64: 1, 1>, scalar_prefetch = 0 : i64, scratch_operands = 1 : i64, tpu.core_type = #tpu.core_type<tc>, window_params = [{transform_indices = @transform_0, window_bounds = array<i64: 16, 1024>}, {transform_indices = @transform_1, window_bounds = array<i64: 1024, 128>}, {pipeline_mode = #tpu.pipeline_mode<synchronous>, transform_indices = @transform_2, window_bounds = array<i64: 1, 128>}, {pipeline_mode = #tpu.pipeline_mode<synchronous>, transform_indices = @transform_3, window_bounds = array<i64: 1, 128, 128>}, {pipeline_mode = #tpu.pipeline_mode<synchronous>, transform_indices = @transform_4, window_bounds = array<i64: 1, 1, 128>}, {transform_indices = @transform_5, window_bounds = array<i64: 16, 128>}]} {
    %c0_i32 = arith.constant 0 : i32
    %0 = arith.cmpi eq, %arg1, %c0_i32 : i32
    %1 = arith.extui %0 : i1 to i32
    %c0_i32_0 = arith.constant 0 : i32
    %2 = arith.cmpi ne, %1, %c0_i32_0 : i32
    scf.if %2 {
      %cst_10 = arith.constant 0.000000e+00 : f32
      %12 = vector.broadcast %cst_10 : f32 to vector<16x128xf32>
      %c0_11 = arith.constant 0 : index
      %c0_12 = arith.constant 0 : index
      %13 = vector.load %arg8[%c0_11, %c0_12] : memref<16x128xf32, #tpu.memory_space<vmem>>, vector<16x128xf32>
      tpu.vector_store %arg8[%c0_11, %c0_12], %12 {strides = array<i32>} : memref<16x128xf32, #tpu.memory_space<vmem>>, vector<16x128xf32>,
    } else {
    }
    %c0 = arith.constant 0 : index
    %c0_1 = arith.constant 0 : index
    %3 = vector.load %arg8[%c0, %c0_1] : memref<16x128xf32, #tpu.memory_space<vmem>>, vector<16x128xf32>
    %c0_2 = arith.constant 0 : index
    %c0_3 = arith.constant 0 : index
    %4 = vector.load %arg2[%c0_2, %c0_3] : memref<16x1024xbf16, #tpu.memory_space<vmem>>, vector<16x1024xbf16>
    %c0_4 = arith.constant 0 : index
    %c0_5 = arith.constant 0 : index
    %5 = vector.load %arg3[%c0_4, %c0_5] : memref<1024x128xbf16, #tpu.memory_space<vmem>>, vector<1024x128xbf16>
    %cst = arith.constant dense<0.000000e+00> : vector<16x128xf32>
    %6 = tpu.matmul %4, %5, %cst {dimension_numbers = #tpu.dot_dimension_numbers<[1], [0], [0], [1], [0, 0, 1, 1], [], []>} : vector<16x1024xbf16>, vector<1024x128xbf16>, vector<16x128xf32> -> vector<16x128xf32>
    %7 = arith.addf %3, %6 : vector<16x128xf32>
    %c0_6 = arith.constant 0 : index
    %c0_7 = arith.constant 0 : index
    %8 = vector.load %arg8[%c0_6, %c0_7] : memref<16x128xf32, #tpu.memory_space<vmem>>, vector<16x128xf32>
    tpu.vector_store %arg8[%c0_6, %c0_7], %7 {strides = array<i32>} : memref<16x128xf32, #tpu.memory_space<vmem>>, vector<16x128xf32>,
    %c0_i32_8 = arith.constant 0 : i32
    %9 = arith.cmpi eq, %arg1, %c0_i32_8 : i32
    %10 = arith.extui %9 : i1 to i32
    %c0_i32_9 = arith.constant 0 : i32
    %11 = arith.cmpi ne, %10, %c0_i32_9 : i32
    scf.if %11 {
      %c0_10 = arith.constant 0 : index
      %c0_11 = arith.constant 0 : index
      %12 = vector.load %arg8[%c0_10, %c0_11] : memref<16x128xf32, #tpu.memory_space<vmem>>, vector<16x128xf32>
      %c0_12 = arith.constant 0 : index
      %c0_13 = arith.constant 0 : index
      %13 = vector.load %arg4[%c0_12, %c0_13] : memref<1x128xf32, #tpu.memory_space<vmem>>, vector<1x128xf32>
      %14 = vector.broadcast %13 : vector<1x128xf32> to vector<16x128xf32>
      %15 = arith.addf %12, %14 : vector<16x128xf32>
      %cst_14 = arith.constant 0.000000e+00 : f32
      %16 = vector.broadcast %cst_14 : f32 to vector<16x128xf32>
      %17 = arith.maximumf %15, %16 : vector<16x128xf32>
      %18 = arith.truncf %17 : vector<16x128xf32> to vector<16x128xbf16>
      %c0_15 = arith.constant 0 : index
      %c0_16 = arith.constant 0 : index
      %c0_17 = arith.constant 0 : index
      %19 = vector.load %arg5[%c0_15, %c0_16, %c0_17] : memref<1x128x128xbf16, #tpu.memory_space<vmem>>, vector<1x128x128xbf16>
      %20 = vector.shape_cast %19 : vector<1x128x128xbf16> to vector<128x128xbf16>
      %cst_18 = arith.constant dense<0.000000e+00> : vector<16x128xf32>
      %21 = tpu.matmul %18, %20, %cst_18 {dimension_numbers = #tpu.dot_dimension_numbers<[1], [0], [0], [1], [0, 0, 1, 1], [], []>} : vector<16x128xbf16>, vector<128x128xbf16>, vector<16x128xf32> -> vector<16x128xf32>
      %c0_19 = arith.constant 0 : index
      %c0_20 = arith.constant 0 : index
      %c0_21 = arith.constant 0 : index
      %22 = vector.load %arg6[%c0_19, %c0_20, %c0_21] : memref<1x1x128xf32, #tpu.memory_space<vmem>>, vector<1x1x128xf32>
      %23 = vector.shape_cast %22 : vector<1x1x128xf32> to vector<1x128xf32>
      %24 = vector.broadcast %23 : vector<1x128xf32> to vector<16x128xf32>
      %25 = arith.addf %21, %24 : vector<16x128xf32>
      %cst_22 = arith.constant 0.000000e+00 : f32
      %26 = vector.broadcast %cst_22 : f32 to vector<16x128xf32>
      %27 = arith.maximumf %25, %26 : vector<16x128xf32>
      %28 = arith.truncf %27 : vector<16x128xf32> to vector<16x128xbf16>
      %c0_23 = arith.constant 0 : index
      %c0_24 = arith.constant 0 : index
      %29 = vector.load %arg7[%c0_23, %c0_24] : memref<16x128xbf16, #tpu.memory_space<vmem>>, vector<16x128xbf16>
      tpu.vector_store %arg7[%c0_23, %c0_24], %28 {strides = array<i32>} : memref<16x128xbf16, #tpu.memory_space<vmem>>, vector<16x128xbf16>,
    } else {
    }
    return
  }
  func.func @transform_0(%arg0: i32, %arg1: i32) -> (i32, i32) {
    %c0_i32 = arith.constant 0 : i32
    return %arg0, %arg1 : i32, i32
  }
  func.func @transform_1(%arg0: i32, %arg1: i32) -> (i32, i32) {
    %c0_i32 = arith.constant 0 : i32
    %c0_i32_0 = arith.constant 0 : i32
    return %arg1, %c0_i32 : i32, i32
  }
  func.func @transform_2(%arg0: i32, %arg1: i32) -> (i32, i32) {
    %c0_i32 = arith.constant 0 : i32
    %c0_i32_0 = arith.constant 0 : i32
    %c0_i32_1 = arith.constant 0 : i32
    return %c0_i32, %c0_i32_0 : i32, i32
  }
  func.func @transform_3(%arg0: i32, %arg1: i32) -> (i32, i32, i32) {
    %c0_i32 = arith.constant 0 : i32
    %c0_i32_0 = arith.constant 0 : i32
    %c0_i32_1 = arith.constant 0 : i32
    %c0_i32_2 = arith.constant 0 : i32
    return %c0_i32, %c0_i32_0, %c0_i32_1 : i32, i32, i32
  }
  func.func @transform_4(%arg0: i32, %arg1: i32) -> (i32, i32, i32) {
    %c0_i32 = arith.constant 0 : i32
    %c0_i32_0 = arith.constant 0 : i32
    %c0_i32_1 = arith.constant 0 : i32
    %c0_i32_2 = arith.constant 0 : i32
    return %c0_i32, %c0_i32_0, %c0_i32_1 : i32, i32, i32
  }
  func.func @transform_5(%arg0: i32, %arg1: i32) -> (i32, i32) {
    %c0_i32 = arith.constant 0 : i32
    %c0_i32_0 = arith.constant 0 : i32
    return %arg0, %c0_i32 : i32, i32
  }
}

module attributes {stable_mosaic.version = 11 : i64} {
  func.func @_decode_kernel(%arg0: i32, %arg1: i32, %arg2: memref<16x128xbf16, #tpu.memory_space<vmem>>, %arg3: memref<128x1024xbf16, #tpu.memory_space<vmem>>, %arg4: memref<1x1024xf32, #tpu.memory_space<vmem>>, %arg5: memref<16x1024xf32, #tpu.memory_space<vmem>>) attributes {dimension_semantics = [#tpu.dimension_semantics<parallel>, #tpu.dimension_semantics<parallel>], iteration_bounds = array<i64: 1, 1>, scalar_prefetch = 0 : i64, scratch_operands = 0 : i64, tpu.core_type = #tpu.core_type<tc>, window_params = [{transform_indices = @transform_0, window_bounds = array<i64: 16, 128>}, {transform_indices = @transform_1, window_bounds = array<i64: 128, 1024>}, {transform_indices = @transform_2, window_bounds = array<i64: 1, 1024>}, {transform_indices = @transform_3, window_bounds = array<i64: 16, 1024>}]} {
    %c0 = arith.constant 0 : index
    %c0_0 = arith.constant 0 : index
    %0 = vector.load %arg2[%c0, %c0_0] : memref<16x128xbf16, #tpu.memory_space<vmem>>, vector<16x128xbf16>
    %c0_1 = arith.constant 0 : index
    %c0_2 = arith.constant 0 : index
    %1 = vector.load %arg3[%c0_1, %c0_2] : memref<128x1024xbf16, #tpu.memory_space<vmem>>, vector<128x1024xbf16>
    %cst = arith.constant dense<0.000000e+00> : vector<16x1024xf32>
    %2 = tpu.matmul %0, %1, %cst {dimension_numbers = #tpu.dot_dimension_numbers<[1], [0], [0], [1], [0, 0, 1, 1], [], []>} : vector<16x128xbf16>, vector<128x1024xbf16>, vector<16x1024xf32> -> vector<16x1024xf32>
    %c0_3 = arith.constant 0 : index
    %c0_4 = arith.constant 0 : index
    %3 = vector.load %arg4[%c0_3, %c0_4] : memref<1x1024xf32, #tpu.memory_space<vmem>>, vector<1x1024xf32>
    %4 = vector.broadcast %3 : vector<1x1024xf32> to vector<16x1024xf32>
    %5 = arith.addf %2, %4 : vector<16x1024xf32>
    %c0_5 = arith.constant 0 : index
    %c0_6 = arith.constant 0 : index
    %6 = vector.load %arg5[%c0_5, %c0_6] : memref<16x1024xf32, #tpu.memory_space<vmem>>, vector<16x1024xf32>
    tpu.vector_store %arg5[%c0_5, %c0_6], %5 {strides = array<i32>} : memref<16x1024xf32, #tpu.memory_space<vmem>>, vector<16x1024xf32>,
    return
  }
  func.func @transform_0(%arg0: i32, %arg1: i32) -> (i32, i32) {
    %c0_i32 = arith.constant 0 : i32
    %c0_i32_0 = arith.constant 0 : i32
    return %arg1, %c0_i32 : i32, i32
  }
  func.func @transform_1(%arg0: i32, %arg1: i32) -> (i32, i32) {
    %c0_i32 = arith.constant 0 : i32
    %c0_i32_0 = arith.constant 0 : i32
    return %c0_i32, %arg0 : i32, i32
  }
  func.func @transform_2(%arg0: i32, %arg1: i32) -> (i32, i32) {
    %c0_i32 = arith.constant 0 : i32
    %c0_i32_0 = arith.constant 0 : i32
    return %c0_i32, %arg0 : i32, i32
  }
  func.func @transform_3(%arg0: i32, %arg1: i32) -> (i32, i32) {
    %c0_i32 = arith.constant 0 : i32
    return %arg1, %arg0 : i32, i32
  }
}

</mosaic_0001>

<bundles_post_ra>
// kernel: vanilla_ae_forward.3
= control target key start
LH: loop header
LB: loop body
LE: loop exit
PB: predicated region body
PF: predicated region fallthrough
CT: control target
= control target key end

     0   :  { %v708_v3 = vmov 0   ;;  %s985_s1 = inlined_call_operand.vmem [shape: bf16[128,1024], index: 1, kind: input, shape index: {}]   ;;  %s986_s0 = inlined_call_operand.vmem [shape: bf16[16,128], index: 0, kind: input, shape index: {}]   ;;  %s987_s2 = inlined_call_operand.vmem [shape: f32[1,1024], index: 2, kind: input, shape index: {}]   ;;  %s988_s3 = inlined_call_operand.vmem [shape: f32[16,1024], index: 3, kind: output, shape index: {}]  }
   0x1   :  { %v17_v0 = vld [vmem:[%s985_s1] sm:$0xff]  ;;  %v18_v2 = vld [vmem:[%s985_s1 + $0x8] sm:$0xff]  ;;  %481 = vmatprep.mubr.bf16.mxu0 %v708_v3  ;;  %524 = vmatprep.mubr.bf16.mxu1 %v708_v3  ;;  %v19_v63 = vld [vmem:[%s985_s1 + $0x10] sm:$0xff] }
   0x2   :  { %v21_v1 = vld [vmem:[%s985_s1 + $0x20] sm:$0xff]  ;;  %v22_v5 = vld [vmem:[%s985_s1 + $0x28] sm:$0xff] }
   0x3   :  { %v643_v4 = vcombine.high %v17_v0, %v21_v1  ;;  %v642_v6 = vcombine.low %v17_v0, %v21_v1  ;;  %v25_v7 = vld [vmem:[%s985_s1 + $0x40] sm:$0xff]  ;;  %v645_v9 = vcombine.high %v18_v2, %v22_v5  ;;  %v644_v10 = vcombine.low %v18_v2, %v22_v5  ;;  %v26_v12 = vld [vmem:[%s985_s1 + $0x48] sm:$0xff]  ;;  %v23_v0 = vld [vmem:[%s985_s1 + $0x30] sm:$0xff] }
   0x4   :  { %v29_v8 = vld [vmem:[%s985_s1 + $0x60] sm:$0xff]  ;;  %v30_v13 = vld [vmem:[%s985_s1 + $0x68] sm:$0xff]  ;;  %v20_v1 = vld [vmem:[%s985_s1 + $0x18] sm:$0xff] }
   0x5   :  { %v651_v11 = vcombine.high %v25_v7, %v29_v8  ;;  %v33_v14 = vld [vmem:[%s985_s1 + $0x80] sm:$0xff]  ;;  %449 = vmatprep.subr.bf16.mxu0 %v643_v4  ;;  %v653_v15 = vcombine.high %v26_v12, %v30_v13  ;;  %v34_v17 = vld [vmem:[%s985_s1 + $0x88] sm:$0xff]  ;;  %492 = vmatprep.subr.bf16.mxu1 %v645_v9  ;;  %v650_v19 = vcombine.low %v25_v7, %v29_v8  ;;  %v24_v2 = vld [vmem:[%s985_s1 + $0x38] sm:$0xff] }
   0x6   :  { %v37_v16 = vld [vmem:[%s985_s1 + $0xa0] sm:$0xff]  ;;  %v38_v18 = vld [vmem:[%s985_s1 + $0xa8] sm:$0xff]  ;;  %450 = vmatpush1.bf16.msra.mxu0 %v642_v6  ;;  %493 = vmatpush1.bf16.msra.mxu1 %v644_v10  ;;  %v652_v20 = vcombine.low %v26_v12, %v30_v13  ;;  %v647_v6 = vcombine.high %v19_v63, %v23_v0  ;;  %v649_v7 = vcombine.high %v20_v1, %v24_v2  ;;  %v27_v8 = vld [vmem:[%s985_s1 + $0x50] sm:$0xff] }
   0x7   :  { %451 = vmatprep.subr.bf16.mxu0 %v651_v11  ;;  %v659_v21 = vcombine.high %v33_v14, %v37_v16  ;;  %494 = vmatprep.subr.bf16.mxu1 %v653_v15  ;;  %v661_v22 = vcombine.high %v34_v17, %v38_v18  ;;  %v41_v23 = vld [vmem:[%s985_s1 + $0xc0] sm:$0xff]  ;;  %v42_v25 = vld [vmem:[%s985_s1 + $0xc8] sm:$0xff]  ;;  %v658_v27 = vcombine.low %v33_v14, %v37_v16  ;;  %v31_v9 = vld [vmem:[%s985_s1 + $0x70] sm:$0xff] }
   0x8   :  { %v45_v24 = vld [vmem:[%s985_s1 + $0xe0] sm:$0xff]  ;;  %v46_v26 = vld [vmem:[%s985_s1 + $0xe8] sm:$0xff]  ;;  %v660_v28 = vcombine.low %v34_v17, %v38_v18  ;;  %v28_v11 = vld [vmem:[%s985_s1 + $0x58] sm:$0xff]  ;;  %v646_v13 = vcombine.low %v19_v63, %v23_v0  ;;  %v648_v14 = vcombine.low %v20_v1, %v24_v2  ;;  %v655_v15 = vcombine.high %v27_v8, %v31_v9 }
   0x9   :  { %v667_v29 = vcombine.high %v41_v23, %v45_v24  ;;  %v669_v30 = vcombine.high %v42_v25, %v46_v26  ;;  %v49_v31 = vld [vmem:[%s985_s1 + $0x100] sm:$0xff]  ;;  %v50_v33 = vld [vmem:[%s985_s1 + $0x108] sm:$0xff]  ;;  %v666_v35 = vcombine.low %v41_v23, %v45_v24  ;;  %v668_v36 = vcombine.low %v42_v25, %v46_v26  ;;  %v32_v12 = vld [vmem:[%s985_s1 + $0x78] sm:$0xff] }
   0xa   :  { %452 = vmatpush1.bf16.msra.mxu0 %v650_v19  ;;  %495 = vmatpush1.bf16.msra.mxu1 %v652_v20  ;;  %v53_v32 = vld [vmem:[%s985_s1 + $0x120] sm:$0xff]  ;;  %v54_v34 = vld [vmem:[%s985_s1 + $0x128] sm:$0xff]  ;;  %v657_v16 = vcombine.high %v28_v11, %v32_v12  ;;  %v35_v17 = vld [vmem:[%s985_s1 + $0x90] sm:$0xff]  ;;  %v83_v2 = vlaneseq }
   0xb   :  { %453 = vmatprep.subr.bf16.mxu0 %v659_v21  ;;  %496 = vmatprep.subr.bf16.mxu1 %v661_v22  ;;  %v675_v37 = vcombine.high %v49_v31, %v53_v32  ;;  %v677_v38 = vcombine.high %v50_v33, %v54_v34  ;;  %v57_v39 = vld [vmem:[%s985_s1 + $0x140] sm:$0xff]  ;;  %v58_v41 = vld [vmem:[%s985_s1 + $0x148] sm:$0xff]  ;;  %v674_v43 = vcombine.low %v49_v31, %v53_v32  ;;  %v39_v18 = vld [vmem:[%s985_s1 + $0xb0] sm:$0xff] }
   0xc   :  { %v61_v40 = vld [vmem:[%s985_s1 + $0x160] sm:$0xff]  ;;  %v62_v42 = vld [vmem:[%s985_s1 + $0x168] sm:$0xff]  ;;  %v676_v44 = vcombine.low %v50_v33, %v54_v34  ;;  %v36_v19 = vld [vmem:[%s985_s1 + $0x98] sm:$0xff]  ;;  %v654_v21 = vcombine.low %v27_v8, %v31_v9  ;;  %v656_v22 = vcombine.low %v28_v11, %v32_v12  ;;  %v663_v23 = vcombine.high %v35_v17, %v39_v18 }
   0xd   :  { %v683_v45 = vcombine.high %v57_v39, %v61_v40  ;;  %v685_v46 = vcombine.high %v58_v41, %v62_v42  ;;  %v65_v47 = vld [vmem:[%s985_s1 + $0x180] sm:$0xff]  ;;  %v66_v49 = vld [vmem:[%s985_s1 + $0x188] sm:$0xff]  ;;  %v682_v51 = vcombine.low %v57_v39, %v61_v40  ;;  %v684_v52 = vcombine.low %v58_v41, %v62_v42  ;;  %v40_v20 = vld [vmem:[%s985_s1 + $0xb8] sm:$0xff] }
   0xe   :  { %454 = vmatpush1.bf16.msra.mxu0 %v658_v27  ;;  %497 = vmatpush1.bf16.msra.mxu1 %v660_v28  ;;  %v69_v48 = vld [vmem:[%s985_s1 + $0x1a0] sm:$0xff]  ;;  %v70_v50 = vld [vmem:[%s985_s1 + $0x1a8] sm:$0xff]  ;;  %v665_v24 = vcombine.high %v36_v19, %v40_v20  ;;  %v43_v25 = vld [vmem:[%s985_s1 + $0xd0] sm:$0xff] }
   0xf   :  { %455 = vmatprep.subr.bf16.mxu0 %v667_v29  ;;  %498 = vmatprep.subr.bf16.mxu1 %v669_v30  ;;  %v691_v53 = vcombine.high %v65_v47, %v69_v48  ;;  %v693_v54 = vcombine.high %v66_v49, %v70_v50  ;;  %v73_v55 = vld [vmem:[%s985_s1 + $0x1c0] sm:$0xff]  ;;  %v74_v57 = vld [vmem:[%s985_s1 + $0x1c8] sm:$0xff]  ;;  %v690_v59 = vcombine.low %v65_v47, %v69_v48  ;;  %v47_v26 = vld [vmem:[%s985_s1 + $0xf0] sm:$0xff] }
  0x10   :  { %v77_v56 = vld [vmem:[%s985_s1 + $0x1e0] sm:$0xff]  ;;  %v78_v58 = vld [vmem:[%s985_s1 + $0x1e8] sm:$0xff]  ;;  %v692_v60 = vcombine.low %v66_v49, %v70_v50  ;;  %v44_v27 = vld [vmem:[%s985_s1 + $0xd8] sm:$0xff]  ;;  %v662_v29 = vcombine.low %v35_v17, %v39_v18  ;;  %v664_v30 = vcombine.low %v36_v19, %v40_v20  ;;  %v671_v31 = vcombine.high %v43_v25, %v47_v26 }
  0x11   :  { %v699_v61 = vcombine.high %v73_v55, %v77_v56  ;;  %v701_v62 = vcombine.high %v74_v57, %v78_v58  ;;  %v698_v4 = vcombine.low %v73_v55, %v77_v56  ;;  %v700_v5 = vcombine.low %v74_v57, %v78_v58  ;;  %v848_v10 = vld [vmem:[%s986_s0] sm:$0xff]   ;;  %v48_v28 = vld [vmem:[%s985_s1 + $0xf8] sm:$0xff]  ;;  %v51_v33 = vld [vmem:[%s985_s1 + $0x110] sm:$0xff] }
  0x12   :  { %456 = vmatpush1.bf16.msra.mxu0 %v666_v35  ;;  %499 = vmatpush1.bf16.msra.mxu1 %v668_v36  ;;  %v673_v32 = vcombine.high %v44_v27, %v48_v28  ;;  %v55_v34 = vld [vmem:[%s985_s1 + $0x130] sm:$0xff]  ;;  %v56_v35 = vld [vmem:[%s985_s1 + $0x138] sm:$0xff]  ;;  %v670_v36 = vcombine.low %v43_v25, %v47_v26 }
  0x13   :  { %457 = vmatprep.subr.bf16.mxu0 %v675_v37  ;;  %500 = vmatprep.subr.bf16.mxu1 %v677_v38  ;;  %v672_v37 = vcombine.low %v44_v27, %v48_v28  ;;  %v679_v38 = vcombine.high %v51_v33, %v55_v34  ;;  %v59_v40 = vld [vmem:[%s985_s1 + $0x150] sm:$0xff]  ;;  %v60_v42 = vld [vmem:[%s985_s1 + $0x158] sm:$0xff] }
  0x14   :  { %v63_v41 = vld [vmem:[%s985_s1 + $0x170] sm:$0xff]  ;;  %v68_v50 = vld [vmem:[%s985_s1 + $0x198] sm:$0xff] }
  0x15   :  { %v67_v48 = vld [vmem:[%s985_s1 + $0x190] sm:$0xff]  ;;  %v76_v58 = vld [vmem:[%s985_s1 + $0x1d8] sm:$0xff] }
  0x16   :  { %458 = vmatpush1.bf16.msra.mxu0 %v674_v43  ;;  %501 = vmatpush1.bf16.msra.mxu1 %v676_v44  ;;  %v64_v43 = vld [vmem:[%s985_s1 + $0x178] sm:$0xff]  ;;  %v678_v44 = vcombine.low %v51_v33, %v55_v34  ;;  %v71_v49 = vld [vmem:[%s985_s1 + $0x1b0] sm:$0xff] }
  0x17   :  { %459 = vmatprep.subr.bf16.mxu0 %v683_v45  ;;  %502 = vmatprep.subr.bf16.mxu1 %v685_v46  ;;  %v687_v46 = vcombine.high %v59_v40, %v63_v41  ;;  %v689_v47 = vcombine.high %v60_v42, %v64_v43  ;;  %v75_v56 = vld [vmem:[%s985_s1 + $0x1d0] sm:$0xff] }
  0x18   :  { %v79_v57 = vld [vmem:[%s985_s1 + $0x1f0] sm:$0xff] }
  0x19   :  { %v702_v0 = vcombine.low %v75_v56, %v79_v57 }
  0x1a   :  { %460 = vmatpush1.bf16.msra.mxu0 %v682_v51  ;;  %503 = vmatpush1.bf16.msra.mxu1 %v684_v52  ;;  %v72_v51 = vld [vmem:[%s985_s1 + $0x1b8] sm:$0xff]  ;;  %v686_v52 = vcombine.low %v59_v40, %v63_v41 }
  0x1b   :  { %461 = vmatprep.subr.bf16.mxu0 %v691_v53  ;;  %504 = vmatprep.subr.bf16.mxu1 %v693_v54  ;;  %v688_v53 = vcombine.low %v60_v42, %v64_v43  ;;  %v695_v54 = vcombine.high %v67_v48, %v71_v49  ;;  %v697_v55 = vcombine.high %v68_v50, %v72_v51 }
  0x1e   :  { %462 = vmatpush1.bf16.msra.mxu0 %v690_v59  ;;  %505 = vmatpush1.bf16.msra.mxu1 %v692_v60  ;;  %v80_v59 = vld [vmem:[%s985_s1 + $0x1f8] sm:$0xff]  ;;  %v694_v60 = vcombine.low %v67_v48, %v71_v49 }
  0x1f   :  { %463 = vmatprep.subr.bf16.mxu0 %v699_v61  ;;  %506 = vmatprep.subr.bf16.mxu1 %v701_v62  ;;  %v696_v61 = vcombine.low %v68_v50, %v72_v51  ;;  %v703_v62 = vcombine.high %v75_v56, %v79_v57  ;;  %v705_v63 = vcombine.high %v76_v58, %v80_v59 }
  0x20   :  { %v704_v1 = vcombine.low %v76_v58, %v80_v59 }
  0x22   :  { %464 = vmatpush1.bf16.msra.mxu0 %v698_v4  ;;  %507 = vmatpush1.bf16.msra.mxu1 %v700_v5  ;;  %v84_v4 = vshrl.u32 %v83_v2, 7 }
  0x23   :  { %535 = vmatprep.subr.bf16.mxu0 %v647_v6  ;;  %578 = vmatprep.subr.bf16.mxu1 %v649_v7  ;;  %v81_v6 = vld [vmem:[%s987_s2] sm:$0xff] }
  0x24   :  { %v85_v5 = vsub.s32 0, %v84_v4  ;;  %v93_v7 = vsub.s32 2, %v84_v4  ;;  %v89_v8 = vsub.s32 1, %v84_v4  ;;  %v97_v9 = vsub.s32 3, %v84_v4 }
  0x25   :  { %482 = vmatmul.mubr.bf16.vlgmr.msra.gmra.mrb[0].mxu0 %v848_v10  ;;  %525 = vmatmul.mubr.bf16.vlgmr.msra.gmra.mrb[0].mxu1 %v848_v10  ;;  %v113_v33 = vsub.s32 7, %v84_v4 }
  0x26   :  { %536 = vmatpush1.bf16.msra.mxu0 %v646_v13  ;;  %579 = vmatpush1.bf16.msra.mxu1 %v648_v14  ;;  %v86_v11 = vrot.slane %v81_v6, %v85_v5  ;;  %v94_v12 = vrot.slane %v81_v6, %v93_v7  ;;  %v90_v13 = vrot.slane %v81_v6, %v89_v8 }
  0x27   :  { %537 = vmatprep.subr.bf16.mxu0 %v655_v15  ;;  %580 = vmatprep.subr.bf16.mxu1 %v657_v16  ;;  %v98_v14 = vrot.slane %v81_v6, %v97_v9 }
  0x28   :  { %567 = vmatprep.mubr.bf16.mxu0 %v708_v3  ;;  %610 = vmatprep.mubr.bf16.mxu1 %v708_v3  ;;  %v52_v3 = vld [vmem:[%s985_s1 + $0x118] sm:$0xff] }
  0x29   :  { %v681_v39 = vcombine.high %v52_v3, %v56_v35  ;;  %v680_v45 = vcombine.low %v52_v3, %v56_v35 }
  0x2a   :  { %538 = vmatpush1.bf16.msra.mxu0 %v654_v21  ;;  %581 = vmatpush1.bf16.msra.mxu1 %v656_v22 }
  0x2b   :  { %539 = vmatprep.subr.bf16.mxu0 %v663_v23  ;;  %582 = vmatprep.subr.bf16.mxu1 %v665_v24 }
  0x2e   :  { %540 = vmatpush1.bf16.msra.mxu0 %v662_v29  ;;  %583 = vmatpush1.bf16.msra.mxu1 %v664_v30  ;;  %v101_v30 = vsub.s32 4, %v84_v4 }
  0x2f   :  { %541 = vmatprep.subr.bf16.mxu0 %v671_v31  ;;  %584 = vmatprep.subr.bf16.mxu1 %v673_v32  ;;  %v109_v31 = vsub.s32 6, %v84_v4  ;;  %v105_v32 = vsub.s32 5, %v84_v4 }
  0x30   :  { %v102_v34 = vrot.slane %v81_v6, %v101_v30 }
  0x31   :  { %v110_v3 = vrot.slane %v81_v6, %v109_v31  ;;  %v106_v35 = vrot.slane %v81_v6, %v105_v32 }
  0x32   :  { %542 = vmatpush1.bf16.msra.mxu0 %v670_v36  ;;  %585 = vmatpush1.bf16.msra.mxu1 %v672_v37  ;;  %v114_v36 = vrot.slane %v81_v6, %v113_v33 }
  0x33   :  { %543 = vmatprep.subr.bf16.mxu0 %v679_v38  ;;  %586 = vmatprep.subr.bf16.mxu1 %v681_v39 }
  0x36   :  { %544 = vmatpush1.bf16.msra.mxu0 %v678_v44  ;;  %587 = vmatpush1.bf16.msra.mxu1 %v680_v45 }
  0x37   :  { %545 = vmatprep.subr.bf16.mxu0 %v687_v46  ;;  %588 = vmatprep.subr.bf16.mxu1 %v689_v47 }
  0x3a   :  { %546 = vmatpush1.bf16.msra.mxu0 %v686_v52  ;;  %589 = vmatpush1.bf16.msra.mxu1 %v688_v53 }
  0x3b   :  { %547 = vmatprep.subr.bf16.mxu0 %v695_v54  ;;  %590 = vmatprep.subr.bf16.mxu1 %v697_v55 }
  0x3e   :  { %548 = vmatpush1.bf16.msra.mxu0 %v694_v60  ;;  %591 = vmatpush1.bf16.msra.mxu1 %v696_v61 }
  0x3f   :  { %549 = vmatprep.subr.bf16.mxu0 %v703_v62  ;;  %592 = vmatprep.subr.bf16.mxu1 %v705_v63 }
  0x42   :  { %550 = vmatpush1.bf16.msra.mxu0 %v702_v0  ;;  %593 = vmatpush1.bf16.msra.mxu1 %v704_v1 }
  0x45   :  { %568 = vmatmul.mubr.bf16.vlgmr.msra.gmra.mrb[4].mxu0 %v848_v10  ;;  %611 = vmatmul.mubr.bf16.vlgmr.msra.gmra.mrb[4].mxu1 %v848_v10 }
  0xf8   :  { %v483_v15 = vpop.f32.mrb[0].mxu0  ;;  %v526_v17 = vpop.f32.mrb[0].mxu1 }
  0xf9   :  { %v484_v16 = vadd.f32 %v483_v15, %v86_v11  ;;  %v485_v18 = vpop.f32.mrb[1].mxu0  ;;  %v527_v19 = vadd.f32 %v526_v17, %v94_v12  ;;  %v528_v20 = vpop.f32.mrb[1].mxu1 }
  0xfa   :  { %v486_v10 = vadd.f32 %v485_v18, %v90_v13  ;;  %v487_v21 = vpop.f32.mrb[2].mxu0  ;;  %v529_v22 = vadd.f32 %v528_v20, %v98_v14  ;;  %v530_v24 = vpop.f32.mrb[2].mxu1 }
  0xfb   :  { %621 = vst [vmem:[%s988_s3] sm:$0xff] %v484_v16  ;;  %v488_v23 = vadd.f32 %v487_v21, %v86_v11  ;;  %v489_v25 = vpop.f32.mrb[3].mxu0  ;;  %623 = vst [vmem:[%s988_s3 + $0x10] sm:$0xff] %v527_v19  ;;  %v531_v26 = vadd.f32 %v530_v24, %v94_v12  ;;  %v532_v28 = vpop.f32.mrb[3].mxu1 }
  0xfc   :  { %622 = vst [vmem:[%s988_s3 + $0x8] sm:$0xff] %v486_v10  ;;  %v490_v27 = vadd.f32 %v489_v25, %v90_v13  ;;  %624 = vst [vmem:[%s988_s3 + $0x18] sm:$0xff] %v529_v22  ;;  %v533_v29 = vadd.f32 %v532_v28, %v98_v14 }
  0xfd   :  { %629 = vst [vmem:[%s988_s3 + $0x40] sm:$0xff] %v488_v23  ;;  %631 = vst [vmem:[%s988_s3 + $0x50] sm:$0xff] %v531_v26 }
  0xfe   :  { %630 = vst [vmem:[%s988_s3 + $0x48] sm:$0xff] %v490_v27  ;;  %632 = vst [vmem:[%s988_s3 + $0x58] sm:$0xff] %v533_v29 }
 0x118   :  { %v569_v37 = vpop.f32.mrb[4].mxu0  ;;  %v612_v39 = vpop.f32.mrb[4].mxu1 }
 0x119   :  { %v570_v38 = vadd.f32 %v569_v37, %v102_v34  ;;  %v571_v40 = vpop.f32.mrb[5].mxu0  ;;  %v613_v41 = vadd.f32 %v612_v39, %v110_v3  ;;  %v614_v43 = vpop.f32.mrb[5].mxu1 }
 0x11a   :  { %v572_v42 = vadd.f32 %v571_v40, %v106_v35  ;;  %v573_v44 = vpop.f32.mrb[6].mxu0  ;;  %v615_v45 = vadd.f32 %v614_v43, %v114_v36  ;;  %v616_v47 = vpop.f32.mrb[6].mxu1 }
 0x11b   :  { %625 = vst [vmem:[%s988_s3 + $0x20] sm:$0xff] %v570_v38  ;;  %v574_v46 = vadd.f32 %v573_v44, %v102_v34  ;;  %v575_v48 = vpop.f32.mrb[7].mxu0  ;;  %627 = vst [vmem:[%s988_s3 + $0x30] sm:$0xff] %v613_v41  ;;  %v617_v49 = vadd.f32 %v616_v47, %v110_v3  ;;  %v618_v51 = vpop.f32.mrb[7].mxu1 }
 0x11c   :  { %626 = vst [vmem:[%s988_s3 + $0x28] sm:$0xff] %v572_v42  ;;  %v576_v50 = vadd.f32 %v575_v48, %v106_v35  ;;  %628 = vst [vmem:[%s988_s3 + $0x38] sm:$0xff] %v615_v45  ;;  %v619_v52 = vadd.f32 %v618_v51, %v114_v36 }
 0x11d   :  { %633 = vst [vmem:[%s988_s3 + $0x60] sm:$0xff] %v574_v46  ;;  %635 = vst [vmem:[%s988_s3 + $0x70] sm:$0xff] %v617_v49 }
 0x11e   :  { %634 = vst [vmem:[%s988_s3 + $0x68] sm:$0xff] %v576_v50  ;;  %636 = vst [vmem:[%s988_s3 + $0x78] sm:$0xff] %v619_v52 }

// kernel: vanilla_ae_forward.2
= control target key start
LH: loop header
LB: loop body
LE: loop exit
PB: predicated region body
PF: predicated region fallthrough
CT: control target
= control target key end

     0   :  { %10 = vsyncpa [#allocation4], 0  ;;  %s1458_s0 = inlined_call_operand.vmem [shape: bf16[16,1024], index: 0, kind: input, shape index: {}]   ;;  %s1459_s1 = inlined_call_operand.hbm [shape: bf16[1024,128], index: 1, kind: input, shape index: {}]   ;;  %s1460_s2 = inlined_call_operand.hbm [shape: f32[1,128], index: 2, kind: input, shape index: {}]   ;;  %s1461_s3 = inlined_call_operand.hbm [shape: bf16[1,128,128], index: 3, kind: input, shape index: {}]   ;;  %s1462_s4 = inlined_call_operand.hbm [shape: f32[1,1,128], index: 4, kind: input, shape index: {}]   ;;  %s1463_s5 = inlined_call_operand.vmem [shape: bf16[16,128], index: 5, kind: output, shape index: {}]  }
   0x1   :  { %11 = vsyncpa [#allocation6], 0 }
   0x2   :  { %12 = vsyncpa [#allocation9], 0  ;;  %s1338_s18 = smov [#allocation5]   ;;  %s1339_s20 = smov [#allocation3]  }
   0x3   :  { %s33_s19 = sshll.u32 %s1338_s18, 4  ;;  %s20_s21 = sshll.u32 %s1339_s20, 4  ;;  %s34_s19 = int_to_ptr.vmem [resolvable:$true] %s33_s19  ;;  %s1376_s21 = int_to_ptr.vmem [resolvable:$true] %s20_s21 }
   0x4   :  { %s1244_s24 = scalar_lea.hbm %s1460_s2, 16 }
   0x5   :  { %p1245_p0 = scmp.ne.s32.totalorder %s1460_s2, %s1244_s24  ;;  %p1248_p1 = scmp.lt.u32.totalorder %s1244_s24, %s1460_s2 }
   0x7   :  { %p1250_p2 = pnand %p1248_p1, %p1245_p0 }
   0x9   :  { %1253 = shalt.err (!%p1250_p2)
}
   0xa   :  { %s1254_s29 = scalar_lea.vmem %s34_s19, 16  ;;  %s1258_s30 = scalar_lea.vmem %s34_s19, 32 }
   0xb   :  { %p1255_p3 = scmp.ne.s32.totalorder %s34_s19, %s1254_s29  ;;  %p1259_p4 = scmp.lt.s32.totalorder %s34_s19, %s34_s19 }
   0xc   :  { %p1260_p5 = scmp.lt.s32.totalorder %s1258_s30, %s1254_s29 }
   0xe   :  { %p1261_p6 = por %p1260_p5, %p1259_p4 }
  0x10   :  { %p1262_p7 = pnand %p1261_p6, %p1255_p3 }
  0x12   :  { %1265 = shalt.err (!%p1262_p7)
}
  0x13   :  { %36 = dma.hbm_to_vmem [thread:$0]  %s1460_s2, 16, %s34_s19, [#allocation6]  }
  0x14   :  { %s1266_s10 = scalar_lea.hbm %s1459_s1, 8192 }
  0x15   :  { %p1267_p8 = scmp.ne.s32.totalorder %s1459_s1, %s1266_s10  ;;  %p1270_p9 = scmp.lt.u32.totalorder %s1266_s10, %s1459_s1 }
  0x17   :  { %p1272_p10 = pnand %p1270_p9, %p1267_p8 }
  0x19   :  { %1275 = shalt.err (!%p1272_p10)
}
  0x1a   :  { %s1276_s15 = scalar_lea.vmem %s1376_s21, 8192  ;;  %p1281_p12 = scmp.lt.s32.totalorder %s1376_s21, %s1376_s21 }
  0x1b   :  { %p1277_p11 = scmp.ne.s32.totalorder %s1376_s21, %s1276_s15  ;;  %p1282_p13 = scmp.lt.s32.totalorder %s1276_s15, %s1276_s15 }
  0x1d   :  { %p1283_p0 = por %p1282_p13, %p1281_p12 }
  0x1f   :  { %p1284_p1 = pnand %p1283_p0, %p1277_p11 }
  0x21   :  { %1287 = shalt.err (!%p1284_p1)
}
  0x22   :  { %s1340_s2 = smov 64   ;;  %s1341_s16 = smov 4  }
  0x23   :  { %26 = dma.hbm_to_vmem [thread:$0]  %s1459_s1, 8192, %s1376_s21, [#allocation4], %s1340_s2, %s1340_s2, %s1341_s16  }
  0x24   :  { %s1342_s19 = smov [#allocation7]   ;;  %s1343_s22 = smov [#allocation8]  }
  0x25   :  { %s42_s20 = sshll.u32 %s1342_s19, 4  ;;  %s55_s23 = sshll.u32 %s1343_s22, 4  ;;  %s43_s20 = int_to_ptr.vmem [resolvable:$true] %s42_s20  ;;  %s56_s23 = int_to_ptr.vmem [resolvable:$true] %s55_s23 }
  0x26   :  { %s1288_s26 = scalar_lea.hbm %s1461_s3, 1024 }
  0x27   :  { %p1289_p2 = scmp.ne.s32.totalorder %s1461_s3, %s1288_s26  ;;  %p1292_p3 = scmp.lt.u32.totalorder %s1288_s26, %s1461_s3 }
  0x29   :  { %p1294_p4 = pnand %p1292_p3, %p1289_p2 }
  0x2b   :  { %1297 = shalt.err (!%p1294_p4)
}
  0x2c   :  { %s1298_s1 = scalar_lea.vmem %s43_s20, 1024  ;;  %p1303_p6 = scmp.lt.s32.totalorder %s43_s20, %s43_s20 }
  0x2d   :  { %p1299_p5 = scmp.ne.s32.totalorder %s43_s20, %s1298_s1  ;;  %p1304_p7 = scmp.lt.s32.totalorder %s1298_s1, %s1298_s1 }
  0x2f   :  { %p1305_p8 = por %p1304_p7, %p1303_p6 }
  0x31   :  { %p1306_p9 = pnand %p1305_p8, %p1299_p5 }
  0x33   :  { %1309 = shalt.err (!%p1306_p9)
}
  0x34   :  { %48 = dma.hbm_to_vmem [thread:$0]  %s1461_s3, 1024, %s43_s20, [#allocation6], %s1340_s2, %s1340_s2, %s1341_s16  }
  0x35   :  { %s1310_s9 = scalar_lea.hbm %s1462_s4, 16 }
  0x36   :  { %p1311_p10 = scmp.ne.s32.totalorder %s1462_s4, %s1310_s9  ;;  %p1314_p11 = scmp.lt.u32.totalorder %s1310_s9, %s1462_s4 }
  0x38   :  { %p1316_p12 = pnand %p1314_p11, %p1311_p10 }
  0x3a   :  { %1319 = shalt.err (!%p1316_p12)
}
  0x3b   :  { %s1320_s14 = scalar_lea.vmem %s56_s23, 16  ;;  %s1324_s15 = scalar_lea.vmem %s56_s23, 32 }
  0x3c   :  { %p1321_p13 = scmp.ne.s32.totalorder %s56_s23, %s1320_s14  ;;  %p1325_p0 = scmp.lt.s32.totalorder %s56_s23, %s56_s23 }
  0x3d   :  { %p1326_p1 = scmp.lt.s32.totalorder %s1324_s15, %s1320_s14 }
  0x3f   :  { %p1327_p2 = por %p1326_p1, %p1325_p0 }
  0x41   :  { %p1328_p3 = pnand %p1327_p2, %p1321_p13 }
  0x43   :  { %1331 = shalt.err (!%p1328_p3)
}
  0x44   :  { %58 = dma.hbm_to_vmem [thread:$0]  %s1462_s4, 16, %s56_s23, [#allocation9]  }
  0x45   :  { %1332 = dma.done.wait [#allocation4], 8192  }
  0x46   :  { %1333 = vsyncadd [#allocation4], 4294959104 }
  0x47   :  { %1334 = dma.done.wait [#allocation6], 1040  }
  0x48   :  { %1335 = vsyncadd [#allocation6], 4294966256 }
  0x49   :  { %1336 = dma.done.wait [#allocation9], 16  }
  0x4a   :  { %1337 = vsyncadd [#allocation9], 4294967280  ;;  %v1172_v0 = vld [vmem:[#allocation3 + $0x40] sm:$0xff]   ;;  %v1176_v4 = vld [vmem:[#allocation3 + $0x48] sm:$0xff]   ;;  %vm1345_vm0 = vmmov 0  }
  0x4b   :  { %v1173_v1 = vld [vmem:[#allocation3 + $0xc0] sm:$0xff]   ;;  %1047 = vmatprep.subr.bf16.mxu0 %v1172_v0  ;;  %v1177_v5 = vld [vmem:[#allocation3 + $0xc8] sm:$0xff]   ;;  %v1180_v8 = vld [vmem:[#allocation3 + $0x50] sm:$0xff]  }
  0x4c   :  { %v1174_v2 = vld [vmem:[#allocation3] sm:$0xff]   ;;  %1069 = vmatprep.subr.bf16.mxu1 %v1173_v1  ;;  %v1178_v6 = vld [vmem:[#allocation3 + $0x8] sm:$0xff]   ;;  %v1181_v9 = vld [vmem:[#allocation3 + $0xd0] sm:$0xff]  }
  0x4d   :  { %v1175_v3 = vld [vmem:[#allocation3 + $0x80] sm:$0xff]   ;;  %1048 = vmatpush3.bf16.msra.mxu0 %v1174_v2  ;;  %v1179_v7 = vld [vmem:[#allocation3 + $0x88] sm:$0xff]   ;;  %v1182_v10 = vld [vmem:[#allocation3 + $0x10] sm:$0xff]  }
  0x4e   :  { %1070 = vmatpush3.bf16.msra.mxu1 %v1175_v3  ;;  %1049 = vmatprep.subr.bf16.mxu0 %v1176_v4  ;;  %v1183_v11 = vld [vmem:[#allocation3 + $0x90] sm:$0xff]   ;;  %v1184_v12 = vld [vmem:[#allocation3 + $0x58] sm:$0xff]   ;;  %v1188_v16 = vld [vmem:[#allocation3 + $0x60] sm:$0xff]  }
  0x4f   :  { %1071 = vmatprep.subr.bf16.mxu1 %v1177_v5  ;;  %v1185_v13 = vld [vmem:[#allocation3 + $0xd8] sm:$0xff]   ;;  %v1189_v17 = vld [vmem:[#allocation3 + $0xe0] sm:$0xff]   ;;  %v1192_v20 = vld [vmem:[#allocation3 + $0x68] sm:$0xff]  }
  0x50   :  { %v1186_v14 = vld [vmem:[#allocation3 + $0x18] sm:$0xff]   ;;  %v1190_v18 = vld [vmem:[#allocation3 + $0x20] sm:$0xff]   ;;  %v1193_v21 = vld [vmem:[#allocation3 + $0xe8] sm:$0xff]  }
  0x51   :  { %1050 = vmatpush3.bf16.msra.mxu0 %v1178_v6  ;;  %v1187_v15 = vld [vmem:[#allocation3 + $0x98] sm:$0xff]   ;;  %v1191_v19 = vld [vmem:[#allocation3 + $0xa0] sm:$0xff]   ;;  %v1194_v22 = vld [vmem:[#allocation3 + $0x28] sm:$0xff]  }
  0x52   :  { %1072 = vmatpush3.bf16.msra.mxu1 %v1179_v7  ;;  %1051 = vmatprep.subr.bf16.mxu0 %v1180_v8  ;;  %v1195_v23 = vld [vmem:[#allocation3 + $0xa8] sm:$0xff]   ;;  %v1196_v24 = vld [vmem:[#allocation3 + $0x70] sm:$0xff]   ;;  %v1200_v28 = vld [vmem:[#allocation3 + $0x78] sm:$0xff]  }
  0x53   :  { %1073 = vmatprep.subr.bf16.mxu1 %v1181_v9  ;;  %v1197_v25 = vld [vmem:[#allocation3 + $0xf0] sm:$0xff]   ;;  %v1201_v29 = vld [vmem:[#allocation3 + $0xf8] sm:$0xff]   ;;  %v80_v32 = vld [vmem:[%s1458_s0] sm:$0xff] }
  0x54   :  { %v1198_v26 = vld [vmem:[#allocation3 + $0x30] sm:$0xff]   ;;  %v1202_v30 = vld [vmem:[#allocation3 + $0x38] sm:$0xff]   ;;  %v84_v33 = vld [vmem:[%s1458_s0 + $0x20] sm:$0xff] }
  0x55   :  { %1052 = vmatpush3.bf16.msra.mxu0 %v1182_v10  ;;  %v1199_v27 = vld [vmem:[#allocation3 + $0xb0] sm:$0xff]   ;;  %v1203_v31 = vld [vmem:[#allocation3 + $0xb8] sm:$0xff]   ;;  %v81_v34 = vld [vmem:[%s1458_s0 + $0x8] sm:$0xff]  ;;  %v956_v35 = vcombine.low %v80_v32, %v84_v33  ;;  %v957_v36 = vcombine.high %v80_v32, %v84_v33 }
  0x56   :  { %1074 = vmatpush3.bf16.msra.mxu1 %v1183_v11  ;;  %1053 = vmatprep.subr.bf16.mxu0 %v1184_v12  ;;  %v85_v37 = vld [vmem:[%s1458_s0 + $0x28] sm:$0xff]  ;;  %v1204_v40 = vld [vmem:[#allocation3 + $0x140] sm:$0xff]   ;;  %v1212_v48 = vld [vmem:[#allocation3 + $0x150] sm:$0xff]  }
  0x57   :  { %1075 = vmatprep.subr.bf16.mxu1 %v1185_v13  ;;  %v958_v38 = vcombine.low %v81_v34, %v85_v37  ;;  %v959_v39 = vcombine.high %v81_v34, %v85_v37  ;;  %672 = vmatprep.mubr.bf16.mxu0 %v957_v36  ;;  %v1205_v41 = vld [vmem:[#allocation3 + $0x1c0] sm:$0xff]   ;;  %v1208_v44 = vld [vmem:[#allocation3 + $0x148] sm:$0xff]   ;;  %v1213_v49 = vld [vmem:[#allocation3 + $0x1d0] sm:$0xff]  }
  0x58   :  { %v1206_v42 = vld [vmem:[#allocation3 + $0x100] sm:$0xff]   ;;  %v1209_v45 = vld [vmem:[#allocation3 + $0x1c8] sm:$0xff]   ;;  %v1214_v50 = vld [vmem:[#allocation3 + $0x110] sm:$0xff]  }
  0x59   :  { %1054 = vmatpush3.bf16.msra.mxu0 %v1186_v14  ;;  %713 = vmatprep.mubr.bf16.mxu1 %v959_v39  ;;  %v1207_v43 = vld [vmem:[#allocation3 + $0x180] sm:$0xff]   ;;  %v1210_v46 = vld [vmem:[#allocation3 + $0x108] sm:$0xff]   ;;  %v1215_v51 = vld [vmem:[#allocation3 + $0x190] sm:$0xff]  }
  0x5a   :  { %1076 = vmatpush3.bf16.msra.mxu1 %v1187_v15  ;;  %1055 = vmatprep.subr.bf16.mxu0 %v1188_v16  ;;  %v1211_v47 = vld [vmem:[#allocation3 + $0x188] sm:$0xff]   ;;  %v1216_v52 = vld [vmem:[#allocation3 + $0x158] sm:$0xff]   ;;  %v1220_v56 = vld [vmem:[#allocation3 + $0x160] sm:$0xff]  }
  0x5b   :  { %1077 = vmatprep.subr.bf16.mxu1 %v1189_v17  ;;  %v1217_v53 = vld [vmem:[#allocation3 + $0x1d8] sm:$0xff]   ;;  %v1221_v57 = vld [vmem:[#allocation3 + $0x1e0] sm:$0xff]   ;;  %v1224_v60 = vld [vmem:[#allocation3 + $0x168] sm:$0xff]   ;;  %v1344_v17 = vmov 0.0  }
  0x5c   :  { %v1218_v54 = vld [vmem:[#allocation3 + $0x118] sm:$0xff]   ;;  %v1222_v58 = vld [vmem:[#allocation3 + $0x120] sm:$0xff]   ;;  %v1225_v61 = vld [vmem:[#allocation3 + $0x1e8] sm:$0xff]  }
  0x5d   :  { %1056 = vmatpush3.bf16.msra.mxu0 %v1190_v18  ;;  %v1219_v55 = vld [vmem:[#allocation3 + $0x198] sm:$0xff]   ;;  %v1223_v59 = vld [vmem:[#allocation3 + $0x1a0] sm:$0xff]   ;;  %v1226_v62 = vld [vmem:[#allocation3 + $0x128] sm:$0xff]  }
  0x5e   :  { %1078 = vmatpush3.bf16.msra.mxu1 %v1191_v19  ;;  %1057 = vmatprep.subr.bf16.mxu0 %v1192_v20  ;;  %v1227_v63 = vld [vmem:[#allocation3 + $0x1a8] sm:$0xff]   ;;  %v1228_v0 = vld [vmem:[#allocation3 + $0x170] sm:$0xff]   ;;  %v1232_v4 = vld [vmem:[#allocation3 + $0x178] sm:$0xff]  }
  0x5f   :  { %1079 = vmatprep.subr.bf16.mxu1 %v1193_v21  ;;  %v1229_v1 = vld [vmem:[#allocation3 + $0x1f0] sm:$0xff]   ;;  %v1233_v5 = vld [vmem:[#allocation3 + $0x1f8] sm:$0xff]   ;;  %v1236_v16 = vld [vmem:[#allocation7] sm:$0xff]  }
  0x60   :  { %v1230_v2 = vld [vmem:[#allocation3 + $0x130] sm:$0xff]   ;;  %v1234_v6 = vld [vmem:[#allocation3 + $0x138] sm:$0xff]   ;;  %v1240_v21 = vld [vmem:[#allocation7 + $0x20] sm:$0xff]  }
  0x61   :  { %1058 = vmatpush3.bf16.msra.mxu0 %v1194_v22  ;;  %v1231_v3 = vld [vmem:[#allocation3 + $0x1b0] sm:$0xff]   ;;  %v1235_v7 = vld [vmem:[#allocation3 + $0x1b8] sm:$0xff]  }
  0x62   :  { %1080 = vmatpush3.bf16.msra.mxu1 %v1195_v23  ;;  %1059 = vmatprep.subr.bf16.mxu0 %v1196_v24  ;;  %v82_v8 = vld [vmem:[%s1458_s0 + $0x10] sm:$0xff]  ;;  %v83_v12 = vld [vmem:[%s1458_s0 + $0x18] sm:$0xff] }
  0x63   :  { %1081 = vmatprep.subr.bf16.mxu1 %v1197_v25  ;;  %v86_v9 = vld [vmem:[%s1458_s0 + $0x30] sm:$0xff]  ;;  %v87_v13 = vld [vmem:[%s1458_s0 + $0x38] sm:$0xff] }
  0x64   :  { %v960_v10 = vcombine.low %v82_v8, %v86_v9  ;;  %v961_v11 = vcombine.high %v82_v8, %v86_v9  ;;  %v962_v14 = vcombine.low %v83_v12, %v87_v13  ;;  %v963_v15 = vcombine.high %v83_v12, %v87_v13  ;;  %v1237_v18 = vld [vmem:[#allocation7 + $0x8] sm:$0xff]   ;;  %v1238_v19 = vld [vmem:[#allocation7 + $0x10] sm:$0xff]   ;;  %v1239_v20 = vld [vmem:[#allocation7 + $0x18] sm:$0xff]  }
  0x65   :  { %1060 = vmatpush3.bf16.msra.mxu0 %v1198_v26  ;;  %v1241_v22 = vld [vmem:[#allocation7 + $0x28] sm:$0xff]   ;;  %v1242_v23 = vld [vmem:[#allocation7 + $0x30] sm:$0xff]   ;;  %v1243_v24 = vld [vmem:[#allocation7 + $0x38] sm:$0xff]  }
  0x66   :  { %1082 = vmatpush3.bf16.msra.mxu1 %v1199_v27  ;;  %1061 = vmatprep.subr.bf16.mxu0 %v1200_v28 }
  0x67   :  { %1083 = vmatprep.subr.bf16.mxu1 %v1201_v29 }
  0x69   :  { %1062 = vmatpush3.bf16.msra.mxu0 %v1202_v30 }
  0x6a   :  { %1084 = vmatpush3.bf16.msra.mxu1 %v1203_v31  ;;  %1091 = vmatprep.subr.bf16.mxu0 %v1204_v40 }
  0x6b   :  { %1113 = vmatprep.subr.bf16.mxu1 %v1205_v41 }
  0x6c   :  { %673 = vmatmul.mubr.bf16.vlgmr.msra.gmra.mrb[0].mxu0 %v956_v35 }
  0x6d   :  { %714 = vmatmul.mubr.bf16.vlgmr.msra.gmra.mrb[0].mxu1 %v958_v38  ;;  %1092 = vmatpush3.bf16.msra.mxu0 %v1206_v42 }
  0x6e   :  { %1114 = vmatpush3.bf16.msra.mxu1 %v1207_v43  ;;  %1093 = vmatprep.subr.bf16.mxu0 %v1208_v44 }
  0x6f   :  { %1115 = vmatprep.subr.bf16.mxu1 %v1209_v45  ;;  %754 = vmatprep.mubr.bf16.mxu0 %v961_v11 }
  0x70   :  { %795 = vmatprep.mubr.bf16.mxu1 %v963_v15 }
  0x71   :  { %1094 = vmatpush3.bf16.msra.mxu0 %v1210_v46 }
  0x72   :  { %1116 = vmatpush3.bf16.msra.mxu1 %v1211_v47  ;;  %1095 = vmatprep.subr.bf16.mxu0 %v1212_v48 }
  0x73   :  { %1117 = vmatprep.subr.bf16.mxu1 %v1213_v49 }
  0x75   :  { %1096 = vmatpush3.bf16.msra.mxu0 %v1214_v50 }
  0x76   :  { %1118 = vmatpush3.bf16.msra.mxu1 %v1215_v51  ;;  %1097 = vmatprep.subr.bf16.mxu0 %v1216_v52  ;;  %v1028_v51 = vld [vmem:[#allocation5] ss:$0 sm:$0xff] }
  0x77   :  { %1119 = vmatprep.subr.bf16.mxu1 %v1217_v53 }
  0x79   :  { %1098 = vmatpush3.bf16.msra.mxu0 %v1218_v54 }
  0x7a   :  { %1120 = vmatpush3.bf16.msra.mxu1 %v1219_v55  ;;  %1099 = vmatprep.subr.bf16.mxu0 %v1220_v56 }
  0x7b   :  { %1121 = vmatprep.subr.bf16.mxu1 %v1221_v57 }
  0x7d   :  { %1100 = vmatpush3.bf16.msra.mxu0 %v1222_v58 }
  0x7e   :  { %1122 = vmatpush3.bf16.msra.mxu1 %v1223_v59  ;;  %1101 = vmatprep.subr.bf16.mxu0 %v1224_v60 }
  0x7f   :  { %1123 = vmatprep.subr.bf16.mxu1 %v1225_v61  ;;  %v1029_v61 = vld [vmem:[#allocation8] ss:$0 sm:$0xff] }
  0x81   :  { %1102 = vmatpush3.bf16.msra.mxu0 %v1226_v62 }
  0x82   :  { %1124 = vmatpush3.bf16.msra.mxu1 %v1227_v63  ;;  %1103 = vmatprep.subr.bf16.mxu0 %v1228_v0 }
  0x83   :  { %1125 = vmatprep.subr.bf16.mxu1 %v1229_v1 }
  0x85   :  { %1104 = vmatpush3.bf16.msra.mxu0 %v1230_v2 }
  0x86   :  { %1126 = vmatpush3.bf16.msra.mxu1 %v1231_v3  ;;  %1105 = vmatprep.subr.bf16.mxu0 %v1232_v4 }
  0x87   :  { %1127 = vmatprep.subr.bf16.mxu1 %v1233_v5 }
  0x89   :  { %1106 = vmatpush3.bf16.msra.mxu0 %v1234_v6 }
  0x8a   :  { %1128 = vmatpush3.bf16.msra.mxu1 %v1235_v7  ;;  %1144 = vmatprep.subr.bf16.mxu0 %v1344_v17 }
  0x8c   :  { %755 = vmatmul.mubr.bf16.vlgmr.msra.gmra.mrb[4].mxu0 %v960_v10 }
  0x8d   :  { %796 = vmatmul.mubr.bf16.vlgmr.msra.gmra.mrb[4].mxu1 %v962_v14  ;;  %1145 = vmatpush3.bf16.msra.mxu0 %v1236_v16 }
  0x8e   :  { %1146 = vmatprep.subr.bf16.mxu0 %v1344_v17  ;;  %1160 = vmatprep.mubr.msk.bf16.mxu0 %vm1345_vm0, %v1344_v17 }
  0x91   :  { %1147 = vmatpush3.bf16.msra.mxu0 %v1237_v18 }
  0x92   :  { %1148 = vmatprep.subr.bf16.mxu0 %v1344_v17 }
  0x95   :  { %1149 = vmatpush3.bf16.msra.mxu0 %v1238_v19 }
  0x96   :  { %1150 = vmatprep.subr.bf16.mxu0 %v1344_v17 }
  0x99   :  { %1151 = vmatpush3.bf16.msra.mxu0 %v1239_v20 }
  0x9a   :  { %1152 = vmatprep.subr.bf16.mxu0 %v1344_v17 }
  0x9d   :  { %1153 = vmatpush3.bf16.msra.mxu0 %v1240_v21 }
  0x9e   :  { %1154 = vmatprep.subr.bf16.mxu0 %v1344_v17 }
  0xa1   :  { %1155 = vmatpush3.bf16.msra.mxu0 %v1241_v22 }
  0xa2   :  { %1156 = vmatprep.subr.bf16.mxu0 %v1344_v17 }
  0xa5   :  { %1157 = vmatpush3.bf16.msra.mxu0 %v1242_v23 }
  0xa6   :  { %1158 = vmatprep.subr.bf16.mxu0 %v1344_v17 }
  0xa9   :  { %1159 = vmatpush3.bf16.msra.mxu0 %v1243_v24 }
 0x13f   :  { %v1063_v25 = vpop.f32.mrb[0].mxu0 }
 0x140   :  { %v1085_v26 = vpop.f32.mrb[0].mxu1  ;;  %v1064_v27 = vpop.f32.mrb[1].mxu0 }
 0x141   :  { %v1065_v28 = vadd.f32 %v1064_v27, %v1063_v25  ;;  %v1086_v29 = vpop.f32.mrb[1].mxu1  ;;  %v1066_v30 = vpop.f32.mrb[2].mxu0 }
 0x142   :  { %v1087_v31 = vadd.f32 %v1086_v29, %v1085_v26  ;;  %v1088_v32 = vpop.f32.mrb[2].mxu1  ;;  %v1067_v33 = vpop.f32.mrb[3].mxu0 }
 0x143   :  { %v1068_v34 = vadd.f32 %v1067_v33, %v1066_v30  ;;  %v1089_v35 = vpop.f32.mrb[3].mxu1 }
 0x144   :  { %v716_v36 = vadd.f32 %v1087_v31, %v1065_v28  ;;  %v1090_v37 = vadd.f32 %v1089_v35, %v1088_v32 }
 0x146   :  { %v719_v38 = vadd.f32 %v1090_v37, %v1068_v34 }
 0x15f   :  { %v1107_v39 = vpop.f32.mrb[4].mxu0 }
 0x160   :  { %v1129_v40 = vpop.f32.mrb[4].mxu1  ;;  %v1108_v41 = vpop.f32.mrb[5].mxu0 }
 0x161   :  { %v1109_v42 = vadd.f32 %v1108_v41, %v1107_v39  ;;  %v1130_v43 = vpop.f32.mrb[5].mxu1  ;;  %v1110_v44 = vpop.f32.mrb[6].mxu0 }
 0x162   :  { %v1131_v45 = vadd.f32 %v1130_v43, %v1129_v40  ;;  %v1132_v46 = vpop.f32.mrb[6].mxu1  ;;  %v1111_v47 = vpop.f32.mrb[7].mxu0 }
 0x163   :  { %v757_v48 = vadd.f32 %v1109_v42, %v716_v36  ;;  %v1112_v49 = vadd.f32 %v1111_v47, %v1110_v44  ;;  %v1133_v50 = vpop.f32.mrb[7].mxu1 }
 0x164   :  { %v1134_v52 = vadd.f32 %v1133_v50, %v1132_v46 }
 0x165   :  { %v798_v53 = vadd.f32 %v1131_v45, %v757_v48  ;;  %v760_v54 = vadd.f32 %v1112_v49, %v719_v38 }
 0x167   :  { %v820_v55 = vadd.f32 %v1028_v51, %v798_v53  ;;  %v801_v56 = vadd.f32 %v1134_v52, %v760_v54 }
 0x169   :  { %v821_v57 = vadd.f32 %v1028_v51, %v801_v56  ;;  %v822_v58 = vmax.f32 %v820_v55, 0.0 }
 0x16b   :  { %v823_v59 = vmax.f32 %v821_v57, 0.0 }
 0x16d   :  { %v824_v60 = vpack.c.bf16 %v823_v59, %v822_v58 }
 0x16f   :  { %1161 = vmatmul.mubr.bf16.vlgmr.msra.gmra.mrb[8].mxu0 %v824_v60 }
 0x242   :  { %v930_v62 = vpop.f32.mrb[8].mxu0 }
 0x243   :  { %v931_v63 = vadd.f32 %v1029_v61, %v930_v62  ;;  %v1162_v0 = vpop.f32.mrb[9].mxu0 }
 0x244   :  { %v933_v1 = vpop.f32.mrb[10].mxu0 }
 0x245   :  { %v934_v2 = vadd.f32 %v1029_v61, %v933_v1  ;;  %v1163_v3 = vpop.f32.mrb[11].mxu0  ;;  %v937_v4 = vmax.f32 %v931_v63, 0.0 }
 0x247   :  { %v938_v5 = vmax.f32 %v934_v2, 0.0 }
 0x249   :  { %v1045_v6 = vpack.c.bf16 %v938_v5, %v937_v4 }
 0x24b   :  { %1046 = vst [vmem:[%s1463_s5] sm:$0xff] %v1045_v6  }
 0x24c   :  { %953 = vsyncpa [#allocation4], 1 }
 0x24d   :  { %954 = vsyncpa [#allocation6], 1 }
 0x24e   :  { %955 = vsyncpa [#allocation9], 1 }

</bundles_post_ra>
